<compile_context>
chip_gen: v7x
topology: tpu7x:2x2x1
jax: 0.10.0
libtpu: 0.0.40
codegen_flags: <defaults>
</compile_context>

<pallas_src>
import functools

import jax
import jax.numpy as jnp
import numpy as np
from jax.experimental import pallas as pl
from jax.experimental.pallas import tpu as pltpu

LN_EPS = 1e-5


def _round_up(x, m):
  return (x + m - 1) // m * m


def residual_kernel(x_ref, gamma_ref, beta_ref, w_ref, b_ref, o_ref):
  # x tile: (TM, D) rows; params broadcast (constant index_map -> resident).
  x = x_ref[...].astype(jnp.float32)
  d = o_ref.shape[-1]

  # --- pre-norm LayerNorm, single-pass statistics (eps=1e-5) ---
  # var = E[x^2] - E[x]^2 : the two reductions are independent (shorter XLU
  # dependency chain, one fewer full-tile VALU pass than the centered form).
  m1 = jnp.mean(x, axis=-1, keepdims=True)
  m2 = jnp.mean(x * x, axis=-1, keepdims=True)
  var = jnp.maximum(m2 - m1 * m1, 0.0)
  xn = (x - m1) * jax.lax.rsqrt(var + LN_EPS)
  xn = xn * gamma_ref[...] + beta_ref[...]            # (TM, D)*(1, D)+(1, D)

  # --- fused gate|module matmul on the MXU: bf16 operands, f32 accumulate ---
  # (TM, D) @ (D, 2D) + (1, 2D); scale_p is pre-folded into the module half.
  gm = jnp.dot(xn.astype(jnp.bfloat16), w_ref[...],
               preferred_element_type=jnp.float32) + b_ref[...]
  g = jax.nn.sigmoid(gm[:, :d])                       # gate half
  y = gm[:, d:]                                       # scaled module half

  # --- gate, (postnorm == Identity), residual add ---
  o_ref[...] = (y * g + x).astype(o_ref.dtype)


@functools.partial(jax.jit, static_argnames=("tm",))
def residual_forward(x, gamma, beta, wg, bg, wm, bm, scale_p, *, tm=2048):
  B, T, D = x.shape
  R = B * T

  # Param prep (one-time, inside jit): fuse gate+module weights, fold scale_p
  # into the module half, pre-cast weights to bf16 for the MXU.
  scale = scale_p.reshape(()).astype(jnp.float32)
  w_fused = jnp.concatenate([wg, wm * scale], axis=1).astype(jnp.bfloat16)
  b_fused = jnp.concatenate([bg, bm * scale], axis=1).astype(jnp.float32)

  # Row tile: big (HBM-roofline regime), multiple of 8, and capped at ~half
  # the rows so v7x's two TensorCores both get grid steps.  The grid uses
  # cdiv and Pallas clips the ragged final block, so R itself needs no padding.
  half = _round_up(pl.cdiv(R, 2), 8)
  tm_eff = max(8, _round_up(min(tm, half), 8))
  grid = (pl.cdiv(R, tm_eff),)

  x2 = x.reshape(R, D)
  param_map = lambda i: (0, 0)                        # loop-invariant params

  out = pl.pallas_call(
      residual_kernel,
      out_shape=jax.ShapeDtypeStruct((R, D), x.dtype),
      grid_spec=pltpu.PrefetchScalarGridSpec(
          num_scalar_prefetch=0,
          grid=grid,
          in_specs=[
              pl.BlockSpec((tm_eff, D), lambda i: (i, 0)),   # x rows
              pl.BlockSpec((1, D), param_map),               # ln gamma
              pl.BlockSpec((1, D), param_map),               # ln beta
              pl.BlockSpec((D, 2 * D), param_map),           # fused weight (bf16)
              pl.BlockSpec((1, 2 * D), param_map),           # fused bias (f32)
          ],
          out_specs=pl.BlockSpec((tm_eff, D), lambda i: (i, 0)),
      ),
      compiler_params=pltpu.CompilerParams(
          dimension_semantics=("parallel",),
          vmem_limit_bytes=48 * 1024 * 1024),
  )(x2, gamma, beta, w_fused, b_fused)

  return out.reshape(B, T, D)


def reference_forward(x, gamma, beta, wg, bg, wm, bm, scale_p):
  # Pure f32 reference with PyTorch LayerNorm semantics (module semantics).
  xf = x.astype(jnp.float32)
  mean = jnp.mean(xf, axis=-1, keepdims=True)
  var = jnp.mean((xf - mean) ** 2, axis=-1, keepdims=True)
  xn = (xf - mean) * jax.lax.rsqrt(var + LN_EPS) * gamma[0] + beta[0]
  g = jax.nn.sigmoid(xn @ wg + bg[0])
  y = xn @ wm + bm[0]
  y = y * g * scale_p[0, 0]
  return (y + xf).astype(x.dtype)


if __name__ == "__main__":
  B, T, D = 2, 8, 128
  key = jax.random.PRNGKey(0)
  kx, kg, kb, kwg, kbg, kwm, kbm = jax.random.split(key, 7)

  x = jax.random.normal(kx, (B, T, D), dtype=jnp.float32)

  # LayerNorm affine params (deterministic, non-trivial).
  gamma = (1.0 + 0.1 * jax.random.normal(kg, (1, D))).astype(jnp.float32)
  beta = (0.1 * jax.random.normal(kb, (1, D))).astype(jnp.float32)

  # Gate Linear(dim, dim): stored pre-transposed as (in, out); y = x @ W + b.
  wg = (jax.random.normal(kwg, (D, D)) / np.sqrt(D)).astype(jnp.float32)
  bg = (0.02 * jax.random.normal(kbg, (1, D))).astype(jnp.float32)

  # Wrapped module Linear(dim, dim), same layout.
  wm = (jax.random.normal(kwm, (D, D)) / np.sqrt(D)).astype(jnp.float32)
  bm = (0.02 * jax.random.normal(kbm, (1, D))).astype(jnp.float32)

  # scale_p parameter, initialized to 0.5 as in the module.
  scale_p = jnp.full((1, 1), 0.5, dtype=jnp.float32)

  # Tolerances relaxed vs. the f32 reference because the kernel matmul runs in
  # bf16 with f32 accumulation (per perf review).
  RTOL, ATOL = 3e-2, 3e-2

  out = residual_forward(x, gamma, beta, wg, bg, wm, bm, scale_p)
  out = jax.block_until_ready(out)
  ref = reference_forward(x, gamma, beta, wg, bg, wm, bm, scale_p)
  np.testing.assert_allclose(np.asarray(out), np.asarray(ref),
                             rtol=RTOL, atol=ATOL)

  # Ragged, multi-tile row count: exercises the clipped final block path
  # (R = 300 rows, no host-side padding, 2 grid steps).
  B2, T2 = 3, 100
  x2 = jax.random.normal(jax.random.PRNGKey(1), (B2, T2, D), dtype=jnp.float32)
  out2 = jax.block_until_ready(
      residual_forward(x2, gamma, beta, wg, bg, wm, bm, scale_p, tm=256))
  ref2 = reference_forward(x2, gamma, beta, wg, bg, wm, bm, scale_p)
  np.testing.assert_allclose(np.asarray(out2), np.asarray(ref2),
                             rtol=RTOL, atol=ATOL)

  print("KERNEL_OK")
</pallas_src>

<mosaic_0001>
module attributes {stable_mosaic.version = 11 : i64} {
  func.func @residual_kernel(%arg0: i32, %arg1: memref<8x128xf32, #tpu.memory_space<vmem>>, %arg2: memref<1x128xf32, #tpu.memory_space<vmem>>, %arg3: memref<1x128xf32, #tpu.memory_space<vmem>>, %arg4: memref<128x256xbf16, #tpu.memory_space<vmem>>, %arg5: memref<1x256xf32, #tpu.memory_space<vmem>>, %arg6: memref<8x128xf32, #tpu.memory_space<vmem>>) attributes {dimension_semantics = [#tpu.dimension_semantics<parallel>], iteration_bounds = array<i64: 2>, scalar_prefetch = 0 : i64, scratch_operands = 0 : i64, tpu.core_type = #tpu.core_type<tc>, window_params = [{transform_indices = @transform_0, window_bounds = array<i64: 8, 128>}, {pipeline_mode = #tpu.pipeline_mode<synchronous>, transform_indices = @transform_1, window_bounds = array<i64: 1, 128>}, {pipeline_mode = #tpu.pipeline_mode<synchronous>, transform_indices = @transform_2, window_bounds = array<i64: 1, 128>}, {pipeline_mode = #tpu.pipeline_mode<synchronous>, transform_indices = @transform_3, window_bounds = array<i64: 128, 256>}, {pipeline_mode = #tpu.pipeline_mode<synchronous>, transform_indices = @transform_4, window_bounds = array<i64: 1, 256>}, {transform_indices = @transform_5, window_bounds = array<i64: 8, 128>}]} {
    %c0 = arith.constant 0 : index
    %c0_0 = arith.constant 0 : index
    %0 = vector.load %arg1[%c0, %c0_0] : memref<8x128xf32, #tpu.memory_space<vmem>>, vector<8x128xf32>
    %cst = arith.constant dense<0.000000e+00> : vector<8xf32>
    %1 = vector.multi_reduction <add>, %0, %cst [1] : vector<8x128xf32> to vector<8xf32>
    %2 = vector.shape_cast %1 : vector<8xf32> to vector<8x1xf32>
    %cst_1 = arith.constant 1.280000e+02 : f32
    %3 = vector.broadcast %cst_1 : f32 to vector<8x1xf32>
    %4 = arith.divf %2, %3 : vector<8x1xf32>
    %5 = arith.mulf %0, %0 : vector<8x128xf32>
    %cst_2 = arith.constant dense<0.000000e+00> : vector<8xf32>
    %6 = vector.multi_reduction <add>, %5, %cst_2 [1] : vector<8x128xf32> to vector<8xf32>
    %7 = vector.shape_cast %6 : vector<8xf32> to vector<8x1xf32>
    %cst_3 = arith.constant 1.280000e+02 : f32
    %8 = vector.broadcast %cst_3 : f32 to vector<8x1xf32>
    %9 = arith.divf %7, %8 : vector<8x1xf32>
    %10 = arith.mulf %4, %4 : vector<8x1xf32>
    %11 = arith.subf %9, %10 : vector<8x1xf32>
    %cst_4 = arith.constant 0.000000e+00 : f32
    %12 = vector.broadcast %cst_4 : f32 to vector<8x1xf32>
    %13 = arith.maximumf %11, %12 : vector<8x1xf32>
    %14 = vector.broadcast %4 : vector<8x1xf32> to vector<8x128xf32>
    %15 = arith.subf %0, %14 : vector<8x128xf32>
    %cst_5 = arith.constant 9.99999974E-6 : f32
    %16 = vector.broadcast %cst_5 : f32 to vector<8x1xf32>
    %17 = arith.addf %13, %16 : vector<8x1xf32>
    %18 = math.rsqrt %17 : vector<8x1xf32>
    %19 = vector.broadcast %18 : vector<8x1xf32> to vector<8x128xf32>
    %20 = arith.mulf %15, %19 : vector<8x128xf32>
    %c0_6 = arith.constant 0 : index
    %c0_7 = arith.constant 0 : index
    %21 = vector.load %arg2[%c0_6, %c0_7] : memref<1x128xf32, #tpu.memory_space<vmem>>, vector<1x128xf32>
    %22 = vector.broadcast %21 : vector<1x128xf32> to vector<8x128xf32>
    %23 = arith.mulf %20, %22 : vector<8x128xf32>
    %c0_8 = arith.constant 0 : index
    %c0_9 = arith.constant 0 : index
    %24 = vector.load %arg3[%c0_8, %c0_9] : memref<1x128xf32, #tpu.memory_space<vmem>>, vector<1x128xf32>
    %25 = vector.broadcast %24 : vector<1x128xf32> to vector<8x128xf32>
    %26 = arith.addf %23, %25 : vector<8x128xf32>
    %27 = arith.truncf %26 : vector<8x128xf32> to vector<8x128xbf16>
    %c0_10 = arith.constant 0 : index
    %c0_11 = arith.constant 0 : index
    %28 = vector.load %arg4[%c0_10, %c0_11] : memref<128x256xbf16, #tpu.memory_space<vmem>>, vector<128x256xbf16>
    %cst_12 = arith.constant dense<0.000000e+00> : vector<8x256xf32>
    %29 = tpu.matmul %27, %28, %cst_12 {dimension_numbers = #tpu.dot_dimension_numbers<[1], [0], [0], [1], [0, 0, 1, 1], [], []>} : vector<8x128xbf16>, vector<128x256xbf16>, vector<8x256xf32> -> vector<8x256xf32>
    %c0_13 = arith.constant 0 : index
    %c0_14 = arith.constant 0 : index
    %30 = vector.load %arg5[%c0_13, %c0_14] : memref<1x256xf32, #tpu.memory_space<vmem>>, vector<1x256xf32>
    %31 = vector.broadcast %30 : vector<1x256xf32> to vector<8x256xf32>
    %32 = arith.addf %29, %31 : vector<8x256xf32>
    %33 = vector.extract_strided_slice %32 {offsets = [0, 0], sizes = [8, 128], strides = [1, 1]} : vector<8x256xf32> to vector<8x128xf32>
    %34 = arith.negf %33 : vector<8x128xf32>
    %35 = math.exp %34 : vector<8x128xf32>
    %cst_15 = arith.constant 1.000000e+00 : f32
    %36 = vector.broadcast %cst_15 : f32 to vector<8x128xf32>
    %37 = arith.addf %36, %35 : vector<8x128xf32>
    %38 = arith.divf %36, %37 : vector<8x128xf32>
    %39 = vector.extract_strided_slice %32 {offsets = [0, 128], sizes = [8, 128], strides = [1, 1]} : vector<8x256xf32> to vector<8x128xf32>
    %40 = arith.mulf %39, %38 : vector<8x128xf32>
    %41 = arith.addf %40, %0 : vector<8x128xf32>
    %c0_16 = arith.constant 0 : index
    %c0_17 = arith.constant 0 : index
    %42 = vector.load %arg6[%c0_16, %c0_17] : memref<8x128xf32, #tpu.memory_space<vmem>>, vector<8x128xf32>
    tpu.vector_store %arg6[%c0_16, %c0_17], %41 {strides = array<i32>} : memref<8x128xf32, #tpu.memory_space<vmem>>, vector<8x128xf32>,
    return
  }
  func.func @transform_0(%arg0: i32) -> (i32, i32) {
    %c0_i32 = arith.constant 0 : i32
    %c0_i32_0 = arith.constant 0 : i32
    return %arg0, %c0_i32 : i32, i32
  }
  func.func @transform_1(%arg0: i32) -> (i32, i32) {
    %c0_i32 = arith.constant 0 : i32
    %c0_i32_0 = arith.constant 0 : i32
    %c0_i32_1 = arith.constant 0 : i32
    return %c0_i32, %c0_i32_0 : i32, i32
  }
  func.func @transform_2(%arg0: i32) -> (i32, i32) {
    %c0_i32 = arith.constant 0 : i32
    %c0_i32_0 = arith.constant 0 : i32
    %c0_i32_1 = arith.constant 0 : i32
    return %c0_i32, %c0_i32_0 : i32, i32
  }
  func.func @transform_3(%arg0: i32) -> (i32, i32) {
    %c0_i32 = arith.constant 0 : i32
    %c0_i32_0 = arith.constant 0 : i32
    %c0_i32_1 = arith.constant 0 : i32
    return %c0_i32, %c0_i32_0 : i32, i32
  }
  func.func @transform_4(%arg0: i32) -> (i32, i32) {
    %c0_i32 = arith.constant 0 : i32
    %c0_i32_0 = arith.constant 0 : i32
    %c0_i32_1 = arith.constant 0 : i32
    return %c0_i32, %c0_i32_0 : i32, i32
  }
  func.func @transform_5(%arg0: i32) -> (i32, i32) {
    %c0_i32 = arith.constant 0 : i32
    %c0_i32_0 = arith.constant 0 : i32
    return %arg0, %c0_i32 : i32, i32
  }
}

</mosaic_0001>

<bundles_post_ra>
// kernel: residual_forward.1
= control target key start
LH: loop header
LB: loop body
LE: loop exit
PB: predicated region body
PF: predicated region fallthrough
CT: control target
= control target key end

     0   :  { %10 = vsyncpa [#allocation3], 0  ;;  %s844_s0 = inlined_call_operand.vmem [shape: f32[16,128], index: 0, kind: input, shape index: {}]   ;;  %s845_s1 = inlined_call_operand.vmem [shape: f32[1,128], index: 1, kind: input, shape index: {}]   ;;  %s846_s2 = inlined_call_operand.vmem [shape: f32[1,128], index: 2, kind: input, shape index: {}]   ;;  %s847_s3 = inlined_call_operand.vmem [shape: bf16[128,256], index: 3, kind: input, shape index: {}]   ;;  %s848_s4 = inlined_call_operand.vmem [shape: f32[1,256], index: 4, kind: input, shape index: {}]   ;;  %s849_s5 = inlined_call_operand.hbm [shape: f32[16,128], index: 5, kind: output, shape index: {}]  }
   0x1   :  { %12 = vsyncpa [#allocation3 + $0x1], 0  ;;  %s680_s18 = smov 0   ;;  %s682_s19 = smov 0  }
   0x2   :  { %s684_s20 = smov 0   ;;  %s686_s21 = smov 0  }
   0x3 LB: > { %s701_s22 = sadd.s32 4294967295, %s646_s21   ;;  %s485_s23 = sadd.s32 4294967294, %s646_s21   ;;  %s646_s21 = sphi %s686_s21, %s855_s21   ;;  %s642_s20 = sphi %s684_s20, %s854_s20   ;;  %s638_s19 = sphi %s682_s19, %s853_s19   ;;  %s634_s18 = sphi %s680_s18, %s852_s18  }
   0x4   : > { %s705_s24 = sadd.s32 1, %s646_s21   ;;  %s135_s25 = sadd.s32 1, %s642_s20 }
   0x5   : > { %s132_s26 = ssub.s32 %s646_s21, %s705_s24  ;;  %p145_p0 = scmp.ne.s32.totalorder %s642_s20, %s638_s19 }
   0x6   : > { %p133_p1 = scmp.eq.s32.totalorder %s132_s26, 0  ;;  %p146_p2 = scmp.eq.s32.totalorder %s701_s22, 1 }
   0x7   : > { %p151_p3 = scmp.ne.s32.totalorder %s638_s19, %s634_s18  ;;  %p152_p4 = scmp.eq.s32.totalorder %s485_s23, 1 }
   0x8   : > { %s716_s27 = scalar_select %p133_p1, %s642_s20, %s135_s25  }
   0x9   : > { %p718_p5 = por %p146_p2, %p145_p0  ;;  %p722_p6 = por %p152_p4, %p151_p3 }
   0xa   : > { %p488_p7 = scmp.ge.s32.totalorder %s646_s21, 1  ;;  %p189_p8 = scmp.lt.s32.totalorder %s646_s21, 3 }
   0xc   : > { %p190_p9 = pnand %p488_p7, %p189_p8 }
   0xd   : > { %p216_p10 = scmp.lt.s32.totalorder (!%p190_p9), %s701_s22, 1  ;;  %v554_v0 = vld [vmem:[%s847_s3 + $0x4] ss:$8 sps:$4 sm:$0xff] (!%p190_p9)   ;;  %v556_v3 = vld [vmem:[%s847_s3] ss:$8 sps:$4 sm:$0xff] (!%p190_p9)   ;;  %v648_v13 = vmov (!%p190_p9), 0   ;;  %v272_v35 = vlaneseq (!%p190_p9) }
   0xe   : > { %193 = sbr.rel (%p190_p9) target bundleno = 457 (0x1c9), region = 40  ;;  %362 = vmatprep.subr.bf16.mxu0 (!%p190_p9), %v554_v0  ;;  %v557_v4 = vld [vmem:[%s847_s3 + $0x14] ss:$8 sps:$4 sm:$0xff] (!%p190_p9)   ;;  %v559_v5 = vld [vmem:[%s847_s3 + $0x10] ss:$8 sps:$4 sm:$0xff] (!%p190_p9)   ;;  %394 = vmatprep.mubr.bf16.mxu0 (!%p190_p9), %v648_v13  ;;  %s213_s16 = sand.u32 (!%p190_p9), 1, %s638_s19  }
   0xf   : > { %363 = vmatpush1.bf16.msra.mxu0 (!%p190_p9), %v556_v3  ;;  %v560_v6 = vld [vmem:[%s847_s3 + $0x24] ss:$8 sps:$4 sm:$0xff] (!%p190_p9)   ;;  %v562_v7 = vld [vmem:[%s847_s3 + $0x20] ss:$8 sps:$4 sm:$0xff] (!%p190_p9)   ;;  %v563_v8 = vld [vmem:[%s847_s3 + $0x34] ss:$8 sps:$4 sm:$0xff] (!%p190_p9)  }
  0x10   : > { %364 = vmatprep.subr.bf16.mxu0 (!%p190_p9), %v557_v4  ;;  %v565_v9 = vld [vmem:[%s847_s3 + $0x30] ss:$8 sps:$4 sm:$0xff] (!%p190_p9)   ;;  %v566_v10 = vld [vmem:[%s847_s3 + $0x44] ss:$8 sps:$4 sm:$0xff] (!%p190_p9)   ;;  %v568_v11 = vld [vmem:[%s847_s3 + $0x40] ss:$8 sps:$4 sm:$0xff] (!%p190_p9)  }
  0x11   : > { %v569_v12 = vld [vmem:[%s847_s3 + $0x54] ss:$8 sps:$4 sm:$0xff] (!%p190_p9)   ;;  %v571_v14 = vld [vmem:[%s847_s3 + $0x50] ss:$8 sps:$4 sm:$0xff] (!%p190_p9)   ;;  %v572_v15 = vld [vmem:[%s847_s3 + $0x64] ss:$8 sps:$4 sm:$0xff] (!%p190_p9)  }
  0x12   : > { %v574_v16 = vld [vmem:[%s847_s3 + $0x60] ss:$8 sps:$4 sm:$0xff] (!%p190_p9)   ;;  %v575_v17 = vld [vmem:[%s847_s3 + $0x74] ss:$8 sps:$4 sm:$0xff] (!%p190_p9)   ;;  %v577_v18 = vld [vmem:[%s847_s3 + $0x70] ss:$8 sps:$4 sm:$0xff] (!%p190_p9)  }
  0x13   : > { %365 = vmatpush1.bf16.msra.mxu0 (!%p190_p9), %v559_v5  ;;  %v491_v29 = vld [vmem:[%s845_s1] ss:$0 sm:$0xff] (!%p190_p9)  ;;  %v273_v36 = vshrl.u32 (!%p190_p9), %v272_v35, 7  ;;  %s489_s17 = sshll.u32 (!%p190_p9), %s213_s16, 3  ;;  %s511_s23 = sshll.u32 (!%p190_p9), %s701_s22, 7 }
  0x14   : > { %366 = vmatprep.subr.bf16.mxu0 (!%p190_p9), %v560_v6  ;;  %v492_v31 = vld [vmem:[%s846_s2] ss:$0 sm:$0xff] (!%p190_p9)  ;;  %s215_s25 = scalar_lea.vmem (!%p190_p9), [#allocation2], %s489_s17 }
  0x15   : > { %s217_s7 = scalar_select %p216_p10, %s701_s22, 1  ;;  %v274_v37 = vsub.s32 0, %v273_v36  ;;  %v270_v38 = vld [vmem:[%s848_s4] sm:$0x3]  ;;  %v278_v48 = vsub.s32 1, %v273_v36 }
  0x16   : > { %s426_s26 = sshll.u32 %s215_s25, 4  ;;  %s649_s22 = smov [#allocation2]   ;;  %s804_s26 = int_to_ptr.vmem [resolvable:$true] %s426_s26 }
  0x17   : > { %s490_s8 = sshll.u32 %s217_s7, 3  ;;  %367 = vmatpush1.bf16.msra.mxu0 %v562_v7  ;;  %v275_v39 = vrot.slane %v270_v38, %v274_v37  ;;  %v279_v49 = vrot.slane %v270_v38, %v278_v48  ;;  %s802_s7 = scalar_lea.hbm %s849_s5, %s511_s23 }
  0x18   : > { %s219_s11 = scalar_lea.vmem %s844_s0, %s490_s8  ;;  %368 = vmatprep.subr.bf16.mxu0 %v563_v8  ;;  %s413_s8 = scalar_lea.sflag [#allocation3], %s213_s16 }
  0x19   : > { %v736_v1 = vld [vmem:[%s219_s11] sm:$0xff]  ;;  %s584_s9 = scalar_lea.vmem %s804_s26, 128  ;;  %s588_s10 = sshll.u32 %s649_s22, 4  ;;  %s589_s10 = int_to_ptr.vmem [resolvable:$false] %s588_s10 }
  0x1a   : > { %222 = vadd.xlane.f32.xlu0 %v736_v1  ;;  %v226_v2 = vmul.f32 %v736_v1, %v736_v1  ;;  %p585_p11 = scmp.ne.s32.totalorder %s804_s26, %s584_s9  ;;  %s590_s11 = scalar_lea.vmem %s589_s10, 256 }
  0x1b   : > { %369 = vmatpush1.bf16.msra.mxu0 %v565_v9  ;;  %p591_p0 = scmp.lt.s32.totalorder %s804_s26, %s589_s10  ;;  %p592_p1 = scmp.lt.s32.totalorder %s590_s11, %s584_s9 }
  0x1c   : > { %370 = vmatprep.subr.bf16.mxu0 %v566_v10  ;;  %p586_p12 = pnand %p585_p11, %p718_p5 }
  0x1d   : > { %p593_p2 = por %p592_p1, %p591_p0 }
  0x1e   : > { %227 = vadd.xlane.f32.xlu0 %v226_v2  ;;  %p587_p13 = pneg %p586_p12 }
  0x1f   : > { %371 = vmatpush1.bf16.msra.mxu0 %v568_v11 }
  0x20   : > { %372 = vmatprep.subr.bf16.mxu0 %v569_v12  ;;  %p594_p3 = pnand %p593_p2, %p587_p13 }
  0x23   : > { %373 = vmatpush1.bf16.msra.mxu0 %v571_v14 }
  0x24   : > { %374 = vmatprep.subr.bf16.mxu0 %v572_v15 }
  0x27   : > { %375 = vmatpush1.bf16.msra.mxu0 %v574_v16 }
  0x28   : > { %376 = vmatprep.subr.bf16.mxu0 %v575_v17 }
  0x2b   : > { %377 = vmatpush1.bf16.msra.mxu0 %v577_v18 }
  0xa7   : > { %v223_v19 = vpop.xlane.xlu0 %222 }
  0xa8   : > { %v225_v20 = vmul.f32 0.0078125, %v223_v19 }
  0xaa   : > { %v230_v22 = vmul.f32 %v225_v20, %v225_v20  ;;  %v233_v27 = vsub.f32 %v736_v1, %v225_v20 }
  0xab   : > { %v228_v21 = vpop.xlane.xlu0 %227 }
  0xac   : > { %v229_v23 = vmul.f32 0.0078125, %v228_v21 }
  0xae   : > { %v231_v24 = vsub.f32 %v229_v23, %v230_v22 }
  0xb0   : > { %v232_v25 = vmax.f32 %v231_v24, 0.0 }
  0xb2   : > { %v234_v26 = vadd.f32 1e-05, %v232_v25 }
  0xb4   : > { %578 = vrsqrt.f32 %v234_v26 }
  0xbe   : > { %v579_v28 = vpop.eup %578 }
  0xbf   : > { %v236_v30 = vmul.f32 %v579_v28, %v233_v27 }
  0xc1   : > { %v244_v32 = vmul.f32 %v491_v29, %v236_v30 }
  0xc3   : > { %v252_v33 = vadd.f32 %v492_v31, %v244_v32 }
  0xc5   : > { %v253_v34 = vpack.c.bf16 %v252_v33, %v252_v33 }
  0xc7   : > { %395 = vmatmul.mubr.bf16.vlgmr.msra.gmra.mrb[0].mxu0 %v253_v34 }
 0x19a   : > { %v396_v40 = vpop.f32.mrb[0].mxu0 }
 0x19b   : > { %v397_v41 = vadd.f32 %v396_v40, %v275_v39  ;;  %v398_v42 = vpop.f32.mrb[1].mxu0 }
 0x19c   : > { %v400_v43 = vpop.f32.mrb[2].mxu0  ;;  %v399_v50 = vadd.f32 %v398_v42, %v279_v49 }
 0x19d   : > { %v509_v44 = vmul.f32 -1.442695, %v397_v41  ;;  %v401_v45 = vpop.f32.mrb[3].mxu0 }
 0x19f   : > { %580 = vpow2.f32 %v509_v44 }
 0x1a9   : > { %v581_v46 = vpop.eup %580 }
 0x1aa   : > { %v406_v47 = vadd.f32 1.0, %v581_v46 }
 0x1ac   : > { %582 = vrcp.f32 %v406_v47 }
 0x1b6   : > { %v583_v51 = vpop.eup %582 }
 0x1b7   : > { %v409_v52 = vmul.f32 %v583_v51, %v399_v50 }
 0x1b9   : > { %v410_v53 = vadd.f32 %v409_v52, %v736_v1 }
 0x1bb   : > { %411 = vst [vmem:[%s215_s25] sm:$0xff] %v410_v53 }
 0x1bc   : > { %597 = shalt.err (!%p594_p3)
}
 0x1bd   : > { %s598_s12 = scalar_lea.hbm %s802_s7, 128  ;;  %s602_s15 = scalar_lea.hbm %s849_s5, 256 }
 0x1be   : > { %p599_p4 = scmp.ne.s32.totalorder %s802_s7, %s598_s12  ;;  %p603_p9 = scmp.lt.u32.totalorder %s802_s7, %s849_s5 }
 0x1bf   : > { %p604_p10 = scmp.lt.u32.totalorder %s602_s15, %s598_s12  ;;  %p606_p12 = scmp.lt.u32.totalorder %s598_s12, %s802_s7 }
 0x1c0   : > { %p600_p7 = pnand %p599_p4, %p718_p5 }
 0x1c1   : > { %p605_p11 = por %p604_p10, %p603_p9 }
 0x1c2   : > { %p601_p8 = pneg %p600_p7 }
 0x1c3   : > { %p607_p13 = por %p606_p12, %p605_p11 }
 0x1c5   : > { %p608_p0 = pnand %p607_p13, %p601_p8 }
 0x1c7   : > { %611 = shalt.err (!%p608_p0)
}
 0x1c8   : > { %514 = dma.vmem_to_hbm [thread:$0]  (%p718_p5), %s804_s26, 128, %s802_s7, %s413_s8  }
 0x1c9 PF: > { %p520_p1 = scmp.ge.s32.totalorder %s646_s21, 2  ;;  %s438_s23 = sand.u32 1, %s634_s18  }
 0x1ca   : > { %s439_s25 = scalar_lea.sflag [#allocation3], %s438_s23 }
 0x1cb   : > { %p517_p2 = pnand %p520_p1, %p722_p6 }
 0x1cd   : > { %629 = dma.done.wait (!%p517_p2), %s439_s25, 128  }
 0x1ce   : > { %631 = vsyncadd (!%p517_p2), %s439_s25, 4294967168  ;;  %p15_p3 = scmp.ge.s32.totalorder %s705_s24, 4   ;;  %s852_s18 = smov %s638_s19 }
 0x1cf   : > { %s853_s19 = smov %s642_s20  ;;  %s854_s20 = smov %s716_s27 }
 0x1d0   : > { %s855_s21 = smov %s705_s24  ;;  %17 = sbr.rel (!%p15_p3) target bundleno = 3 (0x3), region = 75 }
 0x1d7   :  { %444 = vsyncpa [#allocation3], 1 }
 0x1d8   :  { %446 = vsyncpa [#allocation3 + $0x1], 1 }

</bundles_post_ra>
